<compile_context>
chip_gen: v5e
topology: v5e:2x2
jax: 0.10.0
libtpu: 0.0.40
codegen_flags: <defaults>
</compile_context>

<pallas_src>
import functools

import jax
import jax.numpy as jnp
from jax.experimental import pallas as pl
from jax.experimental.pallas import tpu as pltpu

LANES = 128         # lane-dense padded output width
F_PAD = 8           # input features zero-padded to a full f32 sublane group
E_CHUNK_MAX = 1024  # edges processed per grid step along the reduction axis


def gnn_kernel(col_ref, xs_ref, w1_ref, b1_ref, w2_ref, b2_ref, out_ref,
               acc_ref):
    """One (target-row block, edge chunk) step of the fused GCN forward.

    col_ref : (1, Ec)      int32  target node id of each edge in this chunk
    xs_ref  : (F_PAD, Ec)  bf16   (norm_e * x[src_e])^T, zero-padded rows/cols
    w1_ref  : (F_PAD, H)   f32    GCNConv weight (input-major), zero-padded
    b1_ref  : (1, H)       f32    GCNConv bias
    w2_ref  : (H, 128)     f32    Linear weight, zero-padded to 128 lanes
    b2_ref  : (1, 128)     f32    Linear bias,  zero-padded to 128 lanes
    out_ref : (tm, 128)    f32    lane-dense output tile
    acc_ref : (F_PAD, tm)  f32    aggregation accumulator (VMEM scratch)
    """
    tm = out_ref.shape[0]
    e_chunk = col_ref.shape[1]
    k = pl.program_id(1)

    @pl.when(k == 0)
    def _():
        acc_ref[...] = jnp.zeros_like(acc_ref)

    # One-hot scatter-add block built on the fly (no N x N adjacency in HBM):
    #   onehot[t, e] = 1  iff  edge e targets node (block_base + t).
    # Subtract the block base on the (1, Ec) row once, then compare against a
    # row iota; the one-hot itself is exactly representable in bf16.
    shifted = col_ref[...] - pl.program_id(0) * tm                # (1, Ec)
    row_iota = jax.lax.broadcasted_iota(jnp.int32, (tm, e_chunk), 0)
    onehot = (shifted == row_iota).astype(jnp.bfloat16)           # (tm, Ec)

    # (A_hat @ X)^T restricted to this row block, accumulated over edge chunks
    # on the MXU: contract the edge (lane) axis of both operands -> (F_PAD, tm)
    acc_ref[...] += jax.lax.dot_general(
        xs_ref[...], onehot,
        dimension_numbers=(((1,), (1,)), ((), ())),
        preferred_element_type=jnp.float32)

    @pl.when(k == pl.num_programs(1) - 1)
    def _():
        # Reassociated feature transform: (tm, H) = acc^T @ W1 + b1, then ReLU.
        h = jnp.maximum(
            jax.lax.dot_general(
                acc_ref[...], w1_ref[...],
                dimension_numbers=(((0,), (0,)), ((), ())),
                preferred_element_type=jnp.float32) + b1_ref[...],
            0.0)                                                   # (tm, H)
        # Output projection into a lane-dense padded tile (unmasked stores).
        out_ref[...] = (
            jnp.dot(h, w2_ref[...], preferred_element_type=jnp.float32)
            + b2_ref[...]
        ).astype(out_ref.dtype)


def _default_tm():
    """128 on v5e (4x128x128 MXU), 256 on v6e/v7x (2x256x256 MXU)."""
    try:
        kind = jax.devices()[0].device_kind.lower()
    except Exception:
        return 128
    return 128 if "v5" in kind else 256


@functools.partial(jax.jit, static_argnames=("tm",))
def gnn_forward(x, edge_index, edge_weight1, w1, b1, w2, b2, *, tm=None):
    """GCN normalization (vectorized, scatter-free) + one gridded Pallas call."""
    if tm is None:
        tm = _default_tm()
    n, f_in = x.shape
    h = w1.shape[1]
    f_out = w2.shape[1]

    # edge_weight = tanh(edge_weight1); self-loops with weight 1.0 (PyG default).
    ew = jnp.tanh(edge_weight1).astype(jnp.float32)
    self_idx = jnp.arange(n, dtype=edge_index.dtype)
    row = jnp.concatenate([edge_index[0], self_idx])              # sources
    col = jnp.concatenate([edge_index[1], self_idx])              # targets
    w = jnp.concatenate([ew, jnp.ones((n,), dtype=jnp.float32)])
    e_tot = row.shape[0]

    # Symmetric GCN normalization; degree over targets via segment_sum (O(E)).
    deg = jax.ops.segment_sum(w, col.astype(jnp.int32), num_segments=n)
    dis = jnp.where(deg > 0, jax.lax.rsqrt(deg), 0.0)
    norm = dis[row] * w * dis[col]                                # (E_tot,)

    # Gather + scale source features once, stored TRANSPOSED so the edge axis
    # is the lane dimension; zero-pad to (F_PAD, E_pad); bf16 for the MXU.
    xs_t = (x.astype(jnp.float32)[row] * norm[:, None]).T         # (F_in, E)

    e_chunk = min(E_CHUNK_MAX, pl.cdiv(e_tot, LANES) * LANES)     # lane-aligned
    e_pad = pl.cdiv(e_tot, e_chunk) * e_chunk
    xs_t = jnp.pad(xs_t, ((0, F_PAD - f_in), (0, e_pad - e_tot))
                   ).astype(jnp.bfloat16)                         # (F_PAD, E_pad)
    # Sentinel -1 never matches a target row (and padded features are zero).
    col2d = jnp.pad(col.astype(jnp.int32), (0, e_pad - e_tot),
                    constant_values=-1).reshape(1, e_pad)

    w1p = jnp.pad(w1.astype(jnp.float32), ((0, F_PAD - f_in), (0, 0)))
    b1r = b1.reshape(1, -1).astype(jnp.float32)
    # Lane-dense padded projection weights (zero pad F_out -> 128 lanes).
    w2p = jnp.pad(w2.astype(jnp.float32), ((0, 0), (0, LANES - f_out)))
    b2p = jnp.pad(b2.reshape(1, -1).astype(jnp.float32),
                  ((0, 0), (0, LANES - f_out)))

    n_pad = pl.cdiv(n, tm) * tm
    grid = (n_pad // tm, e_pad // e_chunk)   # (row blocks, edge chunks)

    out_pad = pl.pallas_call(
        gnn_kernel,
        out_shape=jax.ShapeDtypeStruct((n_pad, LANES), jnp.float32),
        grid_spec=pltpu.PrefetchScalarGridSpec(
            num_scalar_prefetch=0,
            grid=grid,
            in_specs=[
                pl.BlockSpec((1, e_chunk), lambda i, k: (0, k)),       # col ids
                pl.BlockSpec((F_PAD, e_chunk), lambda i, k: (0, k)),   # xs^T
                pl.BlockSpec((F_PAD, h), lambda i, k: (0, 0)),         # W1
                pl.BlockSpec((1, h), lambda i, k: (0, 0)),             # b1
                pl.BlockSpec((h, LANES), lambda i, k: (0, 0)),         # W2 pad
                pl.BlockSpec((1, LANES), lambda i, k: (0, 0)),         # b2 pad
            ],
            out_specs=pl.BlockSpec((tm, LANES), lambda i, k: (i, 0)),
            scratch_shapes=[pltpu.VMEM((F_PAD, tm), jnp.float32)],
        ),
        compiler_params=pltpu.CompilerParams(
            # Row blocks split across TensorCores; edge chunks are a reduction.
            dimension_semantics=("parallel", "arbitrary"),
            vmem_limit_bytes=48 * 1024 * 1024,   # headroom under v7x's 64 MiB
        ),
    )(col2d, xs_t, w1p, b1r, w2p, b2p)

    return out_pad[:n, :f_out]


if __name__ == "__main__":
    key = jax.random.PRNGKey(0)
    k1, k2, k3, k4, kx = jax.random.split(key, 5)

    N = 16        # nodes
    F_IN = 5      # input features (GCNConv(5, 32))
    H = 32        # hidden
    F_OUT = 2     # output (Linear(32, 2))

    # ring graph, both directions -> E = 2*N edges
    src = jnp.arange(N, dtype=jnp.int32)
    dst = (src + 1) % N
    edge_index = jnp.stack(
        [jnp.concatenate([src, dst]), jnp.concatenate([dst, src])], axis=0
    )  # (2, 32)
    E = edge_index.shape[1]

    # parameters (deterministic init)
    edge_weight1 = jnp.ones((E,), dtype=jnp.float32)  # ones_like(edge_attr)
    # GCNConv weight stored as (in, out) so the kernel does X @ W1 (== x @ W.T)
    w1 = (jax.random.normal(k1, (F_IN, H), dtype=jnp.float32)
          * (1.0 / jnp.sqrt(F_IN)))
    b1 = jax.random.normal(k2, (1, H), dtype=jnp.float32) * 0.01
    # Linear(32, 2)
    w2 = (jax.random.normal(k3, (H, F_OUT), dtype=jnp.float32)
          * (1.0 / jnp.sqrt(H)))
    b2 = jax.random.normal(k4, (1, F_OUT), dtype=jnp.float32) * 0.01

    # node features
    x = jax.random.normal(kx, (N, F_IN), dtype=jnp.float32)

    out = gnn_forward(x, edge_index, edge_weight1, w1, b1, w2, b2)
    jax.block_until_ready(out)
    assert out.shape == (N, F_OUT), out.shape

    # Pure-JAX dense reference (small N only) — loose tolerance: xs is bf16 on
    # the MXU path inside the kernel.
    ew_ref = jnp.tanh(edge_weight1)
    row_r = jnp.concatenate([edge_index[0], jnp.arange(N, dtype=jnp.int32)])
    col_r = jnp.concatenate([edge_index[1], jnp.arange(N, dtype=jnp.int32)])
    w_r = jnp.concatenate([ew_ref, jnp.ones((N,), jnp.float32)])
    adj = jnp.zeros((N, N), jnp.float32).at[col_r, row_r].add(w_r)
    deg_r = adj.sum(axis=1)
    dis_r = jnp.where(deg_r > 0, jax.lax.rsqrt(deg_r), 0.0)
    a_hat = dis_r[:, None] * adj * dis_r[None, :]
    ref = jnp.maximum(a_hat @ x @ w1 + b1, 0.0) @ w2 + b2
    assert jnp.allclose(out, ref, atol=5e-2, rtol=5e-2), (
        float(jnp.max(jnp.abs(out - ref))))

    print("KERNEL_OK")
</pallas_src>

<mosaic_0001>
module attributes {stable_mosaic.version = 11 : i64} {
  func.func @gnn_kernel(%arg0: i32, %arg1: i32, %arg2: memref<1x128xi32, #tpu.memory_space<vmem>>, %arg3: memref<8x128xbf16, #tpu.memory_space<vmem>>, %arg4: memref<8x32xf32, #tpu.memory_space<vmem>>, %arg5: memref<1x32xf32, #tpu.memory_space<vmem>>, %arg6: memref<32x128xf32, #tpu.memory_space<vmem>>, %arg7: memref<1x128xf32, #tpu.memory_space<vmem>>, %arg8: memref<256x128xf32, #tpu.memory_space<vmem>>, %arg9: memref<8x256xf32, #tpu.memory_space<vmem>>) attributes {dimension_semantics = [#tpu.dimension_semantics<parallel>, #tpu.dimension_semantics<arbitrary>], iteration_bounds = array<i64: 1, 1>, scalar_prefetch = 0 : i64, scratch_operands = 1 : i64, tpu.core_type = #tpu.core_type<tc>, window_params = [{transform_indices = @transform_0, window_bounds = array<i64: 1, 128>}, {transform_indices = @transform_1, window_bounds = array<i64: 8, 128>}, {pipeline_mode = #tpu.pipeline_mode<synchronous>, transform_indices = @transform_2, window_bounds = array<i64: 8, 32>}, {pipeline_mode = #tpu.pipeline_mode<synchronous>, transform_indices = @transform_3, window_bounds = array<i64: 1, 32>}, {pipeline_mode = #tpu.pipeline_mode<synchronous>, transform_indices = @transform_4, window_bounds = array<i64: 32, 128>}, {pipeline_mode = #tpu.pipeline_mode<synchronous>, transform_indices = @transform_5, window_bounds = array<i64: 1, 128>}, {transform_indices = @transform_6, window_bounds = array<i64: 256, 128>}]} {
    %c0_i32 = arith.constant 0 : i32
    %0 = arith.cmpi eq, %arg1, %c0_i32 : i32
    %1 = arith.extui %0 : i1 to i32
    %c0_i32_0 = arith.constant 0 : i32
    %2 = arith.cmpi ne, %1, %c0_i32_0 : i32
    scf.if %2 {
      %cst_10 = arith.constant 0.000000e+00 : f32
      %21 = vector.broadcast %cst_10 : f32 to vector<8x256xf32>
      %c0_11 = arith.constant 0 : index
      %c0_12 = arith.constant 0 : index
      %22 = vector.load %arg9[%c0_11, %c0_12] : memref<8x256xf32, #tpu.memory_space<vmem>>, vector<8x256xf32>
      tpu.vector_store %arg9[%c0_11, %c0_12], %21 {strides = array<i32>} : memref<8x256xf32, #tpu.memory_space<vmem>>, vector<8x256xf32>,
    } else {
    }
    %c0 = arith.constant 0 : index
    %c0_1 = arith.constant 0 : index
    %3 = vector.load %arg2[%c0, %c0_1] : memref<1x128xi32, #tpu.memory_space<vmem>>, vector<1x128xi32>
    %c256_i32 = arith.constant 256 : i32
    %4 = arith.muli %arg0, %c256_i32 : i32
    %5 = vector.broadcast %4 : i32 to vector<1x128xi32>
    %6 = arith.subi %3, %5 : vector<1x128xi32>
    %7 = tpu.iota {dimensions = array<i32: 0>} : vector<256x128xi32>
    %8 = vector.broadcast %6 : vector<1x128xi32> to vector<256x128xi32>
    %9 = arith.cmpi eq, %8, %7 : vector<256x128xi32>
    %10 = arith.extui %9 : vector<256x128xi1> to vector<256x128xi32>
    %11 = arith.sitofp %10 : vector<256x128xi32> to vector<256x128xf32>
    %12 = arith.truncf %11 : vector<256x128xf32> to vector<256x128xbf16>
    %c0_2 = arith.constant 0 : index
    %c0_3 = arith.constant 0 : index
    %13 = vector.load %arg9[%c0_2, %c0_3] : memref<8x256xf32, #tpu.memory_space<vmem>>, vector<8x256xf32>
    %c0_4 = arith.constant 0 : index
    %c0_5 = arith.constant 0 : index
    %14 = vector.load %arg3[%c0_4, %c0_5] : memref<8x128xbf16, #tpu.memory_space<vmem>>, vector<8x128xbf16>
    %cst = arith.constant dense<0.000000e+00> : vector<8x256xf32>
    %15 = tpu.matmul %14, %12, %cst {dimension_numbers = #tpu.dot_dimension_numbers<[1], [1], [0], [0], [0, 0, 1, 0], [], []>} : vector<8x128xbf16>, vector<256x128xbf16>, vector<8x256xf32> -> vector<8x256xf32>
    %16 = arith.addf %13, %15 : vector<8x256xf32>
    %c0_6 = arith.constant 0 : index
    %c0_7 = arith.constant 0 : index
    %17 = vector.load %arg9[%c0_6, %c0_7] : memref<8x256xf32, #tpu.memory_space<vmem>>, vector<8x256xf32>
    tpu.vector_store %arg9[%c0_6, %c0_7], %16 {strides = array<i32>} : memref<8x256xf32, #tpu.memory_space<vmem>>, vector<8x256xf32>,
    %c0_i32_8 = arith.constant 0 : i32
    %18 = arith.cmpi eq, %arg1, %c0_i32_8 : i32
    %19 = arith.extui %18 : i1 to i32
    %c0_i32_9 = arith.constant 0 : i32
    %20 = arith.cmpi ne, %19, %c0_i32_9 : i32
    scf.if %20 {
      %c0_10 = arith.constant 0 : index
      %c0_11 = arith.constant 0 : index
      %21 = vector.load %arg9[%c0_10, %c0_11] : memref<8x256xf32, #tpu.memory_space<vmem>>, vector<8x256xf32>
      %c0_12 = arith.constant 0 : index
      %c0_13 = arith.constant 0 : index
      %22 = vector.load %arg4[%c0_12, %c0_13] : memref<8x32xf32, #tpu.memory_space<vmem>>, vector<8x32xf32>
      %cst_14 = arith.constant dense<0.000000e+00> : vector<256x32xf32>
      %23 = tpu.matmul %21, %22, %cst_14 {dimension_numbers = #tpu.dot_dimension_numbers<[0], [0], [1], [1], [0, 1, 1, 1], [], []>} : vector<8x256xf32>, vector<8x32xf32>, vector<256x32xf32> -> vector<256x32xf32>
      %c0_15 = arith.constant 0 : index
      %c0_16 = arith.constant 0 : index
      %24 = vector.load %arg5[%c0_15, %c0_16] : memref<1x32xf32, #tpu.memory_space<vmem>>, vector<1x32xf32>
      %25 = vector.broadcast %24 : vector<1x32xf32> to vector<256x32xf32>
      %26 = arith.addf %23, %25 : vector<256x32xf32>
      %cst_17 = arith.constant 0.000000e+00 : f32
      %27 = vector.broadcast %cst_17 : f32 to vector<256x32xf32>
      %28 = arith.maximumf %26, %27 : vector<256x32xf32>
      %c0_18 = arith.constant 0 : index
      %c0_19 = arith.constant 0 : index
      %29 = vector.load %arg6[%c0_18, %c0_19] : memref<32x128xf32, #tpu.memory_space<vmem>>, vector<32x128xf32>
      %cst_20 = arith.constant dense<0.000000e+00> : vector<256x128xf32>
      %30 = tpu.matmul %28, %29, %cst_20 {dimension_numbers = #tpu.dot_dimension_numbers<[1], [0], [0], [1], [0, 0, 1, 1], [], []>} : vector<256x32xf32>, vector<32x128xf32>, vector<256x128xf32> -> vector<256x128xf32>
      %c0_21 = arith.constant 0 : index
      %c0_22 = arith.constant 0 : index
      %31 = vector.load %arg7[%c0_21, %c0_22] : memref<1x128xf32, #tpu.memory_space<vmem>>, vector<1x128xf32>
      %32 = vector.broadcast %31 : vector<1x128xf32> to vector<256x128xf32>
      %33 = arith.addf %30, %32 : vector<256x128xf32>
      %c0_23 = arith.constant 0 : index
      %c0_24 = arith.constant 0 : index
      %34 = vector.load %arg8[%c0_23, %c0_24] : memref<256x128xf32, #tpu.memory_space<vmem>>, vector<256x128xf32>
      tpu.vector_store %arg8[%c0_23, %c0_24], %33 {strides = array<i32>} : memref<256x128xf32, #tpu.memory_space<vmem>>, vector<256x128xf32>,
    } else {
    }
    return
  }
  func.func @transform_0(%arg0: i32, %arg1: i32) -> (i32, i32) {
    %c0_i32 = arith.constant 0 : i32
    %c0_i32_0 = arith.constant 0 : i32
    return %c0_i32, %arg1 : i32, i32
  }
  func.func @transform_1(%arg0: i32, %arg1: i32) -> (i32, i32) {
    %c0_i32 = arith.constant 0 : i32
    %c0_i32_0 = arith.constant 0 : i32
    return %c0_i32, %arg1 : i32, i32
  }
  func.func @transform_2(%arg0: i32, %arg1: i32) -> (i32, i32) {
    %c0_i32 = arith.constant 0 : i32
    %c0_i32_0 = arith.constant 0 : i32
    %c0_i32_1 = arith.constant 0 : i32
    return %c0_i32, %c0_i32_0 : i32, i32
  }
  func.func @transform_3(%arg0: i32, %arg1: i32) -> (i32, i32) {
    %c0_i32 = arith.constant 0 : i32
    %c0_i32_0 = arith.constant 0 : i32
    %c0_i32_1 = arith.constant 0 : i32
    return %c0_i32, %c0_i32_0 : i32, i32
  }
  func.func @transform_4(%arg0: i32, %arg1: i32) -> (i32, i32) {
    %c0_i32 = arith.constant 0 : i32
    %c0_i32_0 = arith.constant 0 : i32
    %c0_i32_1 = arith.constant 0 : i32
    return %c0_i32, %c0_i32_0 : i32, i32
  }
  func.func @transform_5(%arg0: i32, %arg1: i32) -> (i32, i32) {
    %c0_i32 = arith.constant 0 : i32
    %c0_i32_0 = arith.constant 0 : i32
    %c0_i32_1 = arith.constant 0 : i32
    return %c0_i32, %c0_i32_0 : i32, i32
  }
  func.func @transform_6(%arg0: i32, %arg1: i32) -> (i32, i32) {
    %c0_i32 = arith.constant 0 : i32
    %c0_i32_0 = arith.constant 0 : i32
    return %arg0, %c0_i32 : i32, i32
  }
}

</mosaic_0001>

<bundles_post_ra>
// kernel: gnn_forward.1
= control target key start
LH: loop header
LB: loop body
LE: loop exit
PB: predicated region body
PF: predicated region fallthrough
CT: control target
= control target key end

     0   :  { %v33_v0 = vlaneseq  ;;  %v920_v7 = vmov 1.0|1.0   ;;  %s1313_s0 = inlined_call_operand.vmem [shape: s32[1,128], index: 0, kind: input, shape index: {}]   ;;  %s1314_s1 = inlined_call_operand.vmem [shape: bf16[8,128], index: 1, kind: input, shape index: {}]   ;;  %s1315_s2 = inlined_call_operand.vmem [shape: f32[8,32], index: 2, kind: input, shape index: {}]   ;;  %s1316_s3 = inlined_call_operand.vmem [shape: f32[1,32], index: 3, kind: input, shape index: {}]   ;;  %s1317_s4 = inlined_call_operand.vmem [shape: f32[32,128], index: 4, kind: input, shape index: {}]   ;;  %s1318_s5 = inlined_call_operand.vmem [shape: f32[1,128], index: 5, kind: input, shape index: {}]   ;;  %s1319_s6 = inlined_call_operand.vmem [shape: f32[256,128], index: 6, kind: output, shape index: {}]  }
   0x1   :  { %v961_v2 = vld [vmem:[%s1313_s0] ss:$0 sm:$0xff]  ;;  %v531_v56 = vld [vmem:[%s1317_s4 + $0x18] sm:$0xff]  ;;  %v530_v57 = vld [vmem:[%s1317_s4 + $0x10] sm:$0xff] }
   0x2   :  { %v956_v1 = vshrl.u32 %v33_v0, 7  ;;  %v181_v38 = vld [vmem:[%s1314_s1] sm:$0xf]  ;;  %911 = vmatpush.msra.mxu3 %v531_v56  ;;  %v529_v58 = vld [vmem:[%s1317_s4 + $0x8] sm:$0xff] }
   0x3   :  { %v217_v43 = vld [vmem:[%s1315_s2] sm:$0xff] }
   0x4   :  { %v48_v3 = vadd.s32 112, %v956_v1  ;;  %v49_v4 = vadd.s32 120, %v956_v1  ;;  %v46_v5 = vadd.s32 96, %v956_v1  ;;  %v47_v6 = vadd.s32 104, %v956_v1  ;;  %910 = vmatpush.msra.mxu2 %v217_v43  ;;  %912 = vmatpush.msra.mxu3 %v530_v57  ;;  %v528_v60 = vld [vmem:[%s1317_s4] sm:$0xff] }
   0x5   :  { %v44_v8 = vadd.s32 80, %v956_v1  ;;  %v45_v9 = vadd.s32 88, %v956_v1  ;;  %v42_v10 = vadd.s32 64, %v956_v1  ;;  %v43_v11 = vadd.s32 72, %v956_v1  ;;  %v1098_v0 = vld [vmem:[%s1316_s3] ss:$0 sm:$0xff] }
   0x6   :  { %vm81_vm0 = vcmp.eq.s32.totalorder %v961_v2, %v48_v3  ;;  %vm82_vm1 = vcmp.eq.s32.totalorder %v961_v2, %v49_v4  ;;  %vm79_vm3 = vcmp.eq.s32.totalorder %v961_v2, %v46_v5  ;;  %vm80_vm4 = vcmp.eq.s32.totalorder %v961_v2, %v47_v6  ;;  %913 = vmatpush.msra.mxu3 %v529_v58 }
   0x7   :  { %vm814_vm2 = vmpackc.low %vm82_vm1, %vm81_vm0  ;;  %vm77_vm6 = vcmp.eq.s32.totalorder %v961_v2, %v44_v8  ;;  %vm78_vm7 = vcmp.eq.s32.totalorder %v961_v2, %v45_v9  ;;  %vm75_vm9 = vcmp.eq.s32.totalorder %v961_v2, %v42_v10  ;;  %vm76_vm10 = vcmp.eq.s32.totalorder %v961_v2, %v43_v11 }
   0x8   :  { %815 = vmatpush.bf16.xpose.msk.msra.mxu0 %vm814_vm2, %v920_v7  ;;  %vm816_vm5 = vmpackc.low %vm80_vm4, %vm79_vm3  ;;  %v40_v12 = vadd.s32 48, %v956_v1  ;;  %v41_v13 = vadd.s32 56, %v956_v1  ;;  %v38_v14 = vadd.s32 32, %v956_v1  ;;  %v39_v15 = vadd.s32 40, %v956_v1  ;;  %914 = vmatpush.msra.mxu3 %v528_v60 }
   0x9   :  { %vm818_vm8 = vmpackc.low %vm78_vm7, %vm77_vm6  ;;  %v64_v16 = vadd.s32 240, %v956_v1  ;;  %v65_v17 = vadd.s32 248, %v956_v1  ;;  %v62_v18 = vadd.s32 224, %v956_v1  ;;  %v63_v19 = vadd.s32 232, %v956_v1 }
   0xa   :  { %vm820_vm11 = vmpackc.low %vm76_vm10, %vm75_vm9  ;;  %vm73_vm12 = vcmp.eq.s32.totalorder %v961_v2, %v40_v12  ;;  %vm74_vm13 = vcmp.eq.s32.totalorder %v961_v2, %v41_v13  ;;  %vm71_vm1 = vcmp.eq.s32.totalorder %v961_v2, %v38_v14  ;;  %vm72_vm2 = vcmp.eq.s32.totalorder %v961_v2, %v39_v15 }
   0xb   :  { %vm822_vm14 = vmpackc.low %vm74_vm13, %vm73_vm12  ;;  %vm97_vm15 = vcmp.eq.s32.totalorder %v961_v2, %v64_v16  ;;  %vm98_vm0 = vcmp.eq.s32.totalorder %v961_v2, %v65_v17  ;;  %v56_v20 = vadd.s32 176, %v956_v1  ;;  %v57_v21 = vadd.s32 184, %v956_v1 }
   0xc   :  { %vm830_vm3 = vmpackc.low %vm98_vm0, %vm97_vm15  ;;  %v54_v22 = vadd.s32 160, %v956_v1  ;;  %v55_v23 = vadd.s32 168, %v956_v1  ;;  %vm95_vm4 = vcmp.eq.s32.totalorder %v961_v2, %v62_v18  ;;  %v36_v24 = vadd.s32 16, %v956_v1 }
   0xd   :  { %831 = vmatpush.bf16.xpose.msk.msra.mxu1 %vm830_vm3, %v920_v7  ;;  %vm824_vm6 = vmpackc.low %vm72_vm2, %vm71_vm1  ;;  %vm89_vm7 = vcmp.eq.s32.totalorder %v961_v2, %v56_v20  ;;  %v37_v25 = vadd.s32 24, %v956_v1  ;;  %v60_v28 = vadd.s32 208, %v956_v1  ;;  %v61_v29 = vadd.s32 216, %v956_v1 }
   0xe   :  { %vm87_vm9 = vcmp.eq.s32.totalorder %v961_v2, %v54_v22  ;;  %vm88_vm10 = vcmp.eq.s32.totalorder %v961_v2, %v55_v23  ;;  %v52_v30 = vadd.s32 144, %v956_v1  ;;  %v53_v31 = vadd.s32 152, %v956_v1 }
   0xf   :  { %vm1015_vm12 = vmpackc.low %vm88_vm10, %vm87_vm9  ;;  %vm70_vm15 = vcmp.eq.s32.totalorder %v961_v2, %v37_v25  ;;  %vm93_vm1 = vcmp.eq.s32.totalorder %v961_v2, %v60_v28  ;;  %vm94_vm2 = vcmp.eq.s32.totalorder %v961_v2, %v61_v29  ;;  %v35_v32 = vadd.s32 8, %v956_v1 }
  0x10   :  { %817 = vmatpush.bf16.xpose.msk.msra.mxu0 %vm816_vm5, %v920_v7  ;;  %vm96_vm5 = vcmp.eq.s32.totalorder %v961_v2, %v63_v19  ;;  %vm85_vm3 = vcmp.eq.s32.totalorder %v961_v2, %v52_v30  ;;  %v58_v34 = vadd.s32 192, %v956_v1  ;;  %v59_v35 = vadd.s32 200, %v956_v1 }
  0x11   :  { %vm832_vm13 = vmpackc.low %vm96_vm5, %vm95_vm4  ;;  %vm86_vm4 = vcmp.eq.s32.totalorder %v961_v2, %v53_v31  ;;  %v50_v36 = vadd.s32 128, %v956_v1  ;;  %v51_v37 = vadd.s32 136, %v956_v1 }
  0x12   :  { %vm1032_vm5 = vmpackc.low %vm86_vm4, %vm85_vm3  ;;  %vm91_vm10 = vcmp.eq.s32.totalorder %v961_v2, %v58_v34 }
  0x15   :  { %833 = vmatpush.bf16.xpose.msk.msra.mxu1 %vm832_vm13, %v920_v7  ;;  %vm92_vm13 = vcmp.eq.s32.totalorder %v961_v2, %v59_v35 }
  0x18   :  { %819 = vmatpush.bf16.xpose.msk.msra.mxu0 %vm818_vm8, %v920_v7  ;;  %vm90_vm8 = vcmp.eq.s32.totalorder %v961_v2, %v57_v21 }
  0x20   :  { %821 = vmatpush.bf16.xpose.msk.msra.mxu0 %vm820_vm11, %v920_v7  ;;  %vm1011_vm11 = vmpackc.low %vm90_vm8, %vm89_vm7  ;;  %vm67_vm7 = vcmp.eq.s32.totalorder %v961_v2, %v956_v1  ;;  %vm68_vm8 = vcmp.eq.s32.totalorder %v961_v2, %v35_v32 }
  0x21   :  { %vm828_vm9 = vmpackc.low %vm68_vm8, %vm67_vm7 }
  0x28   :  { %823 = vmatpush.bf16.xpose.msk.msra.mxu0 %vm822_vm14, %v920_v7  ;;  %vm69_vm14 = vcmp.eq.s32.totalorder %v961_v2, %v36_v24 }
  0x29   :  { %vm826_vm0 = vmpackc.low %vm70_vm15, %vm69_vm14  ;;  %vm83_vm14 = vcmp.eq.s32.totalorder %v961_v2, %v50_v36  ;;  %vm84_vm15 = vcmp.eq.s32.totalorder %v961_v2, %v51_v37 }
  0x30   :  { %825 = vmatpush.bf16.xpose.msk.msra.mxu0 %vm824_vm6, %v920_v7  ;;  %vm834_vm6 = vmpackc.low %vm94_vm2, %vm93_vm1 }
  0x31   :  { %835 = vmatpush.bf16.xpose.msk.msra.mxu1 %vm834_vm6, %v920_v7  ;;  %vm836_vm1 = vmpackc.low %vm92_vm13, %vm91_vm10 }
  0x38   :  { %827 = vmatpush.bf16.xpose.msk.msra.mxu0 %vm826_vm0, %v920_v7  ;;  %vm844_vm0 = vmpackc.low %vm84_vm15, %vm83_vm14 }
  0x39   :  { %837 = vmatpush.bf16.xpose.msk.msra.mxu1 %vm836_vm1, %v920_v7 }
  0x40   :  { %829 = vmatpush.bf16.xpose.msk.msra.mxu0 %vm828_vm9, %v920_v7 }
  0x41   :  { %839 = vmatpush.bf16.xpose.msk.msra.mxu1 %vm1011_vm11, %v920_v7  ;;  %vm286_vm11 = vcmask 64512  }
  0x47   :  { %190 = vmatmul.bf16.vlgmr.msra.gmra.mxu0 %v181_v38 }
  0x48   :  { %645 = vmatpush.msrb.mxu0 %v531_v56 }
  0x49   :  { %841 = vmatpush.bf16.xpose.msk.msra.mxu1 %vm1015_vm12, %v920_v7  ;;  %vm536_vm12 = vcmask 261120  }
  0x4a   :  { %646 = vmatpush.msrb.mxu0 %v530_v57 }
  0x4c   :  { %647 = vmatpush.msrb.mxu0 %v529_v58 }
  0x4e   :  { %648 = vmatpush.msrb.mxu0 %v528_v60 }
  0x51   :  { %843 = vmatpush.bf16.xpose.msk.msra.mxu1 %vm1032_vm5, %v920_v7 }
  0x59   :  { %845 = vmatpush.bf16.xpose.msk.msra.mxu1 %vm844_vm0, %v920_v7 }
  0x60   :  { %203 = vmatmul.bf16.vlgmr.msra.gmra.mxu1 %v181_v38 }
  0x61   :  { %398 = vmatpush.msrb.mxu1 %v217_v43 }
  0xc4   :  { %v191_v39 = vpop.f32.mrf.mxu0 }
  0xc5   :  { %222 = vxpose.xlu0.b32.start.end [1/1] (short) %v191_v39, 128 }
  0xcc   :  { %v193_v40 = vpop.f32.mrf.mxu0 }
  0xdd   :  { %v204_v41 = vpop.f32.mrf.mxu1 }
  0xe5   :  { %v206_v42 = vpop.f32.mrf.mxu1 }
 0x145   :  { %254 = vxpose.xlu0.b32.start.end [1/1] (short) %v204_v41, 128 }
 0x169   :  { %v238_v44 = vpop.trf.xlu0 }
 0x16a   :  { %846 = vmatmul.msk.f32.vlgmr.msrb.gmra.mxu1 %vm286_vm11, %v238_v44 }
 0x171   :  { %v239_v45 = vpop.trf.xlu0 }
 0x172   :  { %847 = vmatmul.msk.f32.gmra.mxu1 %vm286_vm11, %v239_v45 }
 0x179   :  { %v240_v46 = vpop.trf.xlu0 }
 0x17a   :  { %848 = vmatmul.msk.f32.gmra.mxu1 %vm286_vm11, %v240_v46 }
 0x181   :  { %v241_v47 = vpop.trf.xlu0 }
 0x182   :  { %849 = vmatmul.msk.f32.gmra.mxu1 %vm286_vm11, %v241_v47 }
 0x189   :  { %v242_v48 = vpop.trf.xlu0 }
 0x18a   :  { %850 = vmatmul.msk.f32.gmra.mxu1 %vm286_vm11, %v242_v48 }
 0x191   :  { %v243_v49 = vpop.trf.xlu0 }
 0x192   :  { %851 = vmatmul.msk.f32.gmra.mxu1 %vm286_vm11, %v243_v49 }
 0x199   :  { %v244_v50 = vpop.trf.xlu0 }
 0x19a   :  { %852 = vmatmul.msk.f32.gmra.mxu1 %vm286_vm11, %v244_v50 }
 0x1a1   :  { %v245_v51 = vpop.trf.xlu0 }
 0x1a2   :  { %853 = vmatmul.msk.f32.gmra.mxu1 %vm286_vm11, %v245_v51 }
 0x1a9   :  { %v246_v52 = vpop.trf.xlu0 }
 0x1aa   :  { %854 = vmatmul.msk.f32.gmra.mxu1 %vm286_vm11, %v246_v52 }
 0x1b1   :  { %v247_v53 = vpop.trf.xlu0 }
 0x1b2   :  { %855 = vmatmul.msk.f32.gmra.mxu1 %vm286_vm11, %v247_v53 }
 0x1b9   :  { %v248_v54 = vpop.trf.xlu0 }
 0x1ba   :  { %856 = vmatmul.msk.f32.gmra.mxu1 %vm286_vm11, %v248_v54 }
 0x1c1   :  { %v249_v55 = vpop.trf.xlu0 }
 0x1c2   :  { %857 = vmatmul.msk.f32.vlgmr.msra.gmra.mxu2 %vm286_vm11, %v249_v55 }
 0x1c9   :  { %v250_v59 = vpop.trf.xlu0 }
 0x1ca   :  { %858 = vmatmul.msk.f32.gmra.mxu2 %vm286_vm11, %v250_v59 }
 0x1d1   :  { %v251_v61 = vpop.trf.xlu0 }
 0x1d2   :  { %859 = vmatmul.msk.f32.gmra.mxu2 %vm286_vm11, %v251_v61 }
 0x1d9   :  { %v252_v62 = vpop.trf.xlu0 }
 0x1da   :  { %860 = vmatmul.msk.f32.gmra.mxu2 %vm286_vm11, %v252_v62 }
 0x1e1   :  { %v253_v63 = vpop.trf.xlu0 }
 0x1e2   :  { %861 = vmatmul.msk.f32.gmra.mxu2 %vm286_vm11, %v253_v63 }
 0x1e7   :  { %v400_v1 = vpop.f32.mrf.mxu1 }
 0x1e8   :  { %v401_v2 = vadd.f32 %v1098_v0, %v400_v1  ;;  %v1150_v1 = vld [vmem:[%s1318_s5] ss:$0 sm:$0xff] }
 0x1e9   :  { %v270_v3 = vpop.trf.xlu0 }
 0x1ea   :  { %v496_v4 = vmax.f32 %v401_v2, 0.0  ;;  %862 = vmatmul.msk.f32.gmra.mxu2 %vm286_vm11, %v270_v3 }
 0x1ec   :  { %878 = vmatmul.msk.f32.vlgmr.msrb.gmra.mxu0 %vm536_vm12, %v496_v4 }
 0x1ef   :  { %v403_v5 = vpop.f32.mrf.mxu1 }
 0x1f0   :  { %v404_v6 = vadd.f32 %v1098_v0, %v403_v5 }
 0x1f1   :  { %v271_v7 = vpop.trf.xlu0 }
 0x1f2   :  { %v497_v8 = vmax.f32 %v404_v6, 0.0  ;;  %863 = vmatmul.msk.f32.gmra.mxu2 %vm286_vm11, %v271_v7 }
 0x1f4   :  { %879 = vmatmul.msk.f32.gmra.mxu0 %vm536_vm12, %v497_v8 }
 0x1f7   :  { %v406_v9 = vpop.f32.mrf.mxu1 }
 0x1f8   :  { %v407_v10 = vadd.f32 %v1098_v0, %v406_v9 }
 0x1f9   :  { %v272_v11 = vpop.trf.xlu0 }
 0x1fa   :  { %v498_v12 = vmax.f32 %v407_v10, 0.0  ;;  %864 = vmatmul.msk.f32.gmra.mxu2 %vm286_vm11, %v272_v11 }
 0x1fc   :  { %880 = vmatmul.msk.f32.gmra.mxu0 %vm536_vm12, %v498_v12 }
 0x1ff   :  { %v409_v13 = vpop.f32.mrf.mxu1 }
 0x200   :  { %v410_v14 = vadd.f32 %v1098_v0, %v409_v13 }
 0x201   :  { %v273_v15 = vpop.trf.xlu0 }
 0x202   :  { %v499_v16 = vmax.f32 %v410_v14, 0.0  ;;  %865 = vmatmul.msk.f32.gmra.mxu2 %vm286_vm11, %v273_v15 }
 0x204   :  { %881 = vmatmul.msk.f32.gmra.mxu0 %vm536_vm12, %v499_v16 }
 0x207   :  { %v412_v17 = vpop.f32.mrf.mxu1 }
 0x208   :  { %v413_v18 = vadd.f32 %v1098_v0, %v412_v17 }
 0x209   :  { %v274_v19 = vpop.trf.xlu0 }
 0x20a   :  { %v500_v20 = vmax.f32 %v413_v18, 0.0  ;;  %866 = vmatmul.msk.f32.gmra.mxu2 %vm286_vm11, %v274_v19 }
 0x20c   :  { %882 = vmatmul.msk.f32.gmra.mxu0 %vm536_vm12, %v500_v20 }
 0x20f   :  { %v415_v21 = vpop.f32.mrf.mxu1 }
 0x210   :  { %v416_v22 = vadd.f32 %v1098_v0, %v415_v21 }
 0x211   :  { %v275_v23 = vpop.trf.xlu0 }
 0x212   :  { %v501_v24 = vmax.f32 %v416_v22, 0.0  ;;  %867 = vmatmul.msk.f32.gmra.mxu2 %vm286_vm11, %v275_v23 }
 0x214   :  { %883 = vmatmul.msk.f32.gmra.mxu0 %vm536_vm12, %v501_v24 }
 0x217   :  { %v418_v25 = vpop.f32.mrf.mxu1 }
 0x218   :  { %v419_v26 = vadd.f32 %v1098_v0, %v418_v25 }
 0x219   :  { %v276_v27 = vpop.trf.xlu0 }
 0x21a   :  { %v502_v28 = vmax.f32 %v419_v26, 0.0  ;;  %868 = vmatmul.msk.f32.gmra.mxu2 %vm286_vm11, %v276_v27 }
 0x21c   :  { %884 = vmatmul.msk.f32.gmra.mxu0 %vm536_vm12, %v502_v28 }
 0x21f   :  { %v421_v29 = vpop.f32.mrf.mxu1 }
 0x220   :  { %v422_v30 = vadd.f32 %v1098_v0, %v421_v29 }
 0x221   :  { %v277_v31 = vpop.trf.xlu0 }
 0x222   :  { %v503_v32 = vmax.f32 %v422_v30, 0.0  ;;  %869 = vmatmul.msk.f32.gmra.mxu2 %vm286_vm11, %v277_v31 }
 0x224   :  { %885 = vmatmul.msk.f32.gmra.mxu0 %vm536_vm12, %v503_v32 }
 0x227   :  { %v424_v33 = vpop.f32.mrf.mxu1 }
 0x228   :  { %v425_v34 = vadd.f32 %v1098_v0, %v424_v33 }
 0x229   :  { %v278_v35 = vpop.trf.xlu0 }
 0x22a   :  { %v504_v36 = vmax.f32 %v425_v34, 0.0  ;;  %870 = vmatmul.msk.f32.gmra.mxu2 %vm286_vm11, %v278_v35 }
 0x22c   :  { %886 = vmatmul.msk.f32.gmra.mxu0 %vm536_vm12, %v504_v36 }
 0x22f   :  { %v427_v37 = vpop.f32.mrf.mxu1 }
 0x230   :  { %v428_v38 = vadd.f32 %v1098_v0, %v427_v37 }
 0x231   :  { %v279_v39 = vpop.trf.xlu0 }
 0x232   :  { %v505_v40 = vmax.f32 %v428_v38, 0.0  ;;  %871 = vmatmul.msk.f32.gmra.mxu2 %vm286_vm11, %v279_v39 }
 0x234   :  { %887 = vmatmul.msk.f32.gmra.mxu0 %vm536_vm12, %v505_v40 }
 0x237   :  { %v430_v41 = vpop.f32.mrf.mxu1 }
 0x238   :  { %v431_v42 = vadd.f32 %v1098_v0, %v430_v41 }
 0x239   :  { %v280_v43 = vpop.trf.xlu0 }
 0x23a   :  { %v506_v44 = vmax.f32 %v431_v42, 0.0  ;;  %872 = vmatmul.msk.f32.gmra.mxu2 %vm286_vm11, %v280_v43 }
 0x23c   :  { %888 = vmatmul.msk.f32.gmra.mxu0 %vm536_vm12, %v506_v44 }
 0x241   :  { %v281_v45 = vpop.trf.xlu0 }
 0x242   :  { %873 = vmatmul.msk.f32.gmra.mxu2 %vm286_vm11, %v281_v45 }
 0x245   :  { %v433_v46 = vpop.f32.mrf.mxu2 }
 0x246   :  { %v434_v47 = vadd.f32 %v1098_v0, %v433_v46 }
 0x248   :  { %v507_v48 = vmax.f32 %v434_v47, 0.0 }
 0x249   :  { %v282_v49 = vpop.trf.xlu0 }
 0x24a   :  { %874 = vmatmul.msk.f32.gmra.mxu2 %vm286_vm11, %v282_v49  ;;  %889 = vmatmul.msk.f32.vlgmr.msra.gmra.mxu3 %vm536_vm12, %v507_v48 }
 0x24d   :  { %v436_v50 = vpop.f32.mrf.mxu2 }
 0x24e   :  { %v437_v51 = vadd.f32 %v1098_v0, %v436_v50 }
 0x250   :  { %v508_v52 = vmax.f32 %v437_v51, 0.0 }
 0x251   :  { %v283_v53 = vpop.trf.xlu0 }
 0x252   :  { %875 = vmatmul.msk.f32.gmra.mxu2 %vm286_vm11, %v283_v53  ;;  %890 = vmatmul.msk.f32.gmra.mxu3 %vm536_vm12, %v508_v52 }
 0x255   :  { %v439_v54 = vpop.f32.mrf.mxu2 }
 0x256   :  { %v440_v55 = vadd.f32 %v1098_v0, %v439_v54 }
 0x258   :  { %v509_v56 = vmax.f32 %v440_v55, 0.0 }
 0x259   :  { %v284_v57 = vpop.trf.xlu0 }
 0x25a   :  { %876 = vmatmul.msk.f32.gmra.mxu2 %vm286_vm11, %v284_v57  ;;  %891 = vmatmul.msk.f32.gmra.mxu3 %vm536_vm12, %v509_v56 }
 0x25d   :  { %v442_v58 = vpop.f32.mrf.mxu2 }
 0x25e   :  { %v443_v59 = vadd.f32 %v1098_v0, %v442_v58 }
 0x260   :  { %v510_v60 = vmax.f32 %v443_v59, 0.0 }
 0x261   :  { %v285_v61 = vpop.trf.xlu0 }
 0x262   :  { %877 = vmatmul.msk.f32.gmra.mxu2 %vm286_vm11, %v285_v61  ;;  %892 = vmatmul.msk.f32.gmra.mxu3 %vm536_vm12, %v510_v60 }
 0x265   :  { %v445_v62 = vpop.f32.mrf.mxu2 }
 0x266   :  { %v446_v63 = vadd.f32 %v1098_v0, %v445_v62 }
 0x268   :  { %v511_v2 = vmax.f32 %v446_v63, 0.0 }
 0x269   :  { %v650_v3 = vpop.f32.mrf.mxu0 }
 0x26a   :  { %v651_v4 = vadd.f32 %v1150_v1, %v650_v3  ;;  %893 = vmatmul.msk.f32.gmra.mxu3 %vm536_vm12, %v511_v2 }
 0x26c   :  { %746 = vst [vmem:[%s1319_s6] sm:$0xff] %v651_v4 }
 0x26d   :  { %v448_v5 = vpop.f32.mrf.mxu2 }
 0x26e   :  { %v449_v6 = vadd.f32 %v1098_v0, %v448_v5 }
 0x270   :  { %v512_v7 = vmax.f32 %v449_v6, 0.0 }
 0x271   :  { %v653_v8 = vpop.f32.mrf.mxu0 }
 0x272   :  { %v654_v9 = vadd.f32 %v1150_v1, %v653_v8  ;;  %894 = vmatmul.msk.f32.gmra.mxu3 %vm536_vm12, %v512_v7 }
 0x274   :  { %747 = vst [vmem:[%s1319_s6 + $0x8] sm:$0xff] %v654_v9 }
 0x275   :  { %v451_v10 = vpop.f32.mrf.mxu2 }
 0x276   :  { %v452_v11 = vadd.f32 %v1098_v0, %v451_v10 }
 0x278   :  { %v513_v12 = vmax.f32 %v452_v11, 0.0 }
 0x279   :  { %v656_v13 = vpop.f32.mrf.mxu0 }
 0x27a   :  { %v657_v14 = vadd.f32 %v1150_v1, %v656_v13  ;;  %895 = vmatmul.msk.f32.gmra.mxu3 %vm536_vm12, %v513_v12 }
 0x27c   :  { %748 = vst [vmem:[%s1319_s6 + $0x10] sm:$0xff] %v657_v14 }
 0x27d   :  { %v454_v15 = vpop.f32.mrf.mxu2 }
 0x27e   :  { %v455_v16 = vadd.f32 %v1098_v0, %v454_v15 }
 0x280   :  { %v514_v17 = vmax.f32 %v455_v16, 0.0 }
 0x281   :  { %v659_v18 = vpop.f32.mrf.mxu0 }
 0x282   :  { %v660_v19 = vadd.f32 %v1150_v1, %v659_v18  ;;  %896 = vmatmul.msk.f32.gmra.mxu3 %vm536_vm12, %v514_v17 }
 0x284   :  { %749 = vst [vmem:[%s1319_s6 + $0x18] sm:$0xff] %v660_v19 }
 0x285   :  { %v457_v20 = vpop.f32.mrf.mxu2 }
 0x286   :  { %v458_v21 = vadd.f32 %v1098_v0, %v457_v20 }
 0x288   :  { %v515_v22 = vmax.f32 %v458_v21, 0.0 }
 0x289   :  { %v662_v23 = vpop.f32.mrf.mxu0 }
 0x28a   :  { %v663_v24 = vadd.f32 %v1150_v1, %v662_v23  ;;  %897 = vmatmul.msk.f32.gmra.mxu3 %vm536_vm12, %v515_v22 }
 0x28c   :  { %750 = vst [vmem:[%s1319_s6 + $0x20] sm:$0xff] %v663_v24 }
 0x28d   :  { %v460_v25 = vpop.f32.mrf.mxu2 }
 0x28e   :  { %v461_v26 = vadd.f32 %v1098_v0, %v460_v25 }
 0x290   :  { %v516_v27 = vmax.f32 %v461_v26, 0.0 }
 0x291   :  { %v665_v28 = vpop.f32.mrf.mxu0 }
 0x292   :  { %v666_v29 = vadd.f32 %v1150_v1, %v665_v28  ;;  %898 = vmatmul.msk.f32.gmra.mxu3 %vm536_vm12, %v516_v27 }
 0x294   :  { %751 = vst [vmem:[%s1319_s6 + $0x28] sm:$0xff] %v666_v29 }
 0x295   :  { %v463_v30 = vpop.f32.mrf.mxu2 }
 0x296   :  { %v464_v31 = vadd.f32 %v1098_v0, %v463_v30 }
 0x298   :  { %v517_v32 = vmax.f32 %v464_v31, 0.0 }
 0x299   :  { %v668_v33 = vpop.f32.mrf.mxu0 }
 0x29a   :  { %v669_v34 = vadd.f32 %v1150_v1, %v668_v33  ;;  %899 = vmatmul.msk.f32.gmra.mxu3 %vm536_vm12, %v517_v32 }
 0x29c   :  { %752 = vst [vmem:[%s1319_s6 + $0x30] sm:$0xff] %v669_v34 }
 0x29d   :  { %v466_v35 = vpop.f32.mrf.mxu2 }
 0x29e   :  { %v467_v36 = vadd.f32 %v1098_v0, %v466_v35 }
 0x2a0   :  { %v518_v37 = vmax.f32 %v467_v36, 0.0 }
 0x2a1   :  { %v671_v38 = vpop.f32.mrf.mxu0 }
 0x2a2   :  { %v672_v39 = vadd.f32 %v1150_v1, %v671_v38  ;;  %900 = vmatmul.msk.f32.gmra.mxu3 %vm536_vm12, %v518_v37 }
 0x2a4   :  { %753 = vst [vmem:[%s1319_s6 + $0x38] sm:$0xff] %v672_v39 }
 0x2a5   :  { %v469_v40 = vpop.f32.mrf.mxu2 }
 0x2a6   :  { %v470_v41 = vadd.f32 %v1098_v0, %v469_v40 }
 0x2a8   :  { %v519_v42 = vmax.f32 %v470_v41, 0.0 }
 0x2a9   :  { %v674_v43 = vpop.f32.mrf.mxu0 }
 0x2aa   :  { %v675_v44 = vadd.f32 %v1150_v1, %v674_v43  ;;  %901 = vmatmul.msk.f32.gmra.mxu3 %vm536_vm12, %v519_v42 }
 0x2ac   :  { %754 = vst [vmem:[%s1319_s6 + $0x40] sm:$0xff] %v675_v44 }
 0x2ad   :  { %v472_v45 = vpop.f32.mrf.mxu2 }
 0x2ae   :  { %v473_v46 = vadd.f32 %v1098_v0, %v472_v45 }
 0x2b0   :  { %v520_v47 = vmax.f32 %v473_v46, 0.0 }
 0x2b1   :  { %v677_v48 = vpop.f32.mrf.mxu0 }
 0x2b2   :  { %v678_v49 = vadd.f32 %v1150_v1, %v677_v48  ;;  %902 = vmatmul.msk.f32.gmra.mxu3 %vm536_vm12, %v520_v47 }
 0x2b4   :  { %755 = vst [vmem:[%s1319_s6 + $0x48] sm:$0xff] %v678_v49 }
 0x2b5   :  { %v475_v50 = vpop.f32.mrf.mxu2 }
 0x2b6   :  { %v476_v51 = vadd.f32 %v1098_v0, %v475_v50 }
 0x2b8   :  { %v521_v52 = vmax.f32 %v476_v51, 0.0 }
 0x2b9   :  { %v680_v53 = vpop.f32.mrf.mxu0 }
 0x2ba   :  { %v681_v54 = vadd.f32 %v1150_v1, %v680_v53  ;;  %903 = vmatmul.msk.f32.gmra.mxu3 %vm536_vm12, %v521_v52 }
 0x2bc   :  { %756 = vst [vmem:[%s1319_s6 + $0x50] sm:$0xff] %v681_v54 }
 0x2bd   :  { %v478_v55 = vpop.f32.mrf.mxu2 }
 0x2be   :  { %v479_v56 = vadd.f32 %v1098_v0, %v478_v55 }
 0x2c0   :  { %v522_v57 = vmax.f32 %v479_v56, 0.0 }
 0x2c2   :  { %904 = vmatmul.msk.f32.gmra.mxu3 %vm536_vm12, %v522_v57 }
 0x2c5   :  { %v481_v58 = vpop.f32.mrf.mxu2 }
 0x2c6   :  { %v482_v59 = vadd.f32 %v1098_v0, %v481_v58 }
 0x2c8   :  { %v523_v60 = vmax.f32 %v482_v59, 0.0 }
 0x2ca   :  { %905 = vmatmul.msk.f32.gmra.mxu3 %vm536_vm12, %v523_v60 }
 0x2cd   :  { %v484_v61 = vpop.f32.mrf.mxu2  ;;  %v683_v62 = vpop.f32.mrf.mxu3 }
 0x2ce   :  { %v485_v63 = vadd.f32 %v1098_v0, %v484_v61  ;;  %v684_v2 = vadd.f32 %v1150_v1, %v683_v62 }
 0x2d0   :  { %v524_v3 = vmax.f32 %v485_v63, 0.0  ;;  %757 = vst [vmem:[%s1319_s6 + $0x58] sm:$0xff] %v684_v2 }
 0x2d2   :  { %906 = vmatmul.msk.f32.gmra.mxu3 %vm536_vm12, %v524_v3 }
 0x2d5   :  { %v487_v4 = vpop.f32.mrf.mxu2  ;;  %v686_v5 = vpop.f32.mrf.mxu3 }
 0x2d6   :  { %v488_v6 = vadd.f32 %v1098_v0, %v487_v4  ;;  %v687_v7 = vadd.f32 %v1150_v1, %v686_v5 }
 0x2d8   :  { %v525_v8 = vmax.f32 %v488_v6, 0.0  ;;  %758 = vst [vmem:[%s1319_s6 + $0x60] sm:$0xff] %v687_v7 }
 0x2da   :  { %907 = vmatmul.msk.f32.gmra.mxu3 %vm536_vm12, %v525_v8 }
 0x2dd   :  { %v490_v9 = vpop.f32.mrf.mxu2  ;;  %v689_v10 = vpop.f32.mrf.mxu3 }
 0x2de   :  { %v491_v11 = vadd.f32 %v1098_v0, %v490_v9  ;;  %v690_v12 = vadd.f32 %v1150_v1, %v689_v10 }
 0x2e0   :  { %v526_v13 = vmax.f32 %v491_v11, 0.0  ;;  %759 = vst [vmem:[%s1319_s6 + $0x68] sm:$0xff] %v690_v12 }
 0x2e2   :  { %908 = vmatmul.msk.f32.gmra.mxu3 %vm536_vm12, %v526_v13 }
 0x2e5   :  { %v493_v14 = vpop.f32.mrf.mxu2  ;;  %v692_v15 = vpop.f32.mrf.mxu3 }
 0x2e6   :  { %v494_v16 = vadd.f32 %v1098_v0, %v493_v14  ;;  %v693_v17 = vadd.f32 %v1150_v1, %v692_v15 }
 0x2e8   :  { %v527_v18 = vmax.f32 %v494_v16, 0.0  ;;  %760 = vst [vmem:[%s1319_s6 + $0x70] sm:$0xff] %v693_v17 }
 0x2ea   :  { %909 = vmatmul.msk.f32.gmra.mxu3 %vm536_vm12, %v527_v18 }
 0x2ed   :  { %v695_v19 = vpop.f32.mrf.mxu3 }
 0x2ee   :  { %v696_v20 = vadd.f32 %v1150_v1, %v695_v19 }
 0x2f0   :  { %761 = vst [vmem:[%s1319_s6 + $0x78] sm:$0xff] %v696_v20 }
 0x2f5   :  { %v698_v21 = vpop.f32.mrf.mxu3 }
 0x2f6   :  { %v699_v22 = vadd.f32 %v1150_v1, %v698_v21 }
 0x2f8   :  { %762 = vst [vmem:[%s1319_s6 + $0x80] sm:$0xff] %v699_v22 }
 0x2fd   :  { %v701_v0 = vpop.f32.mrf.mxu3 }
 0x2fe   :  { %v702_v23 = vadd.f32 %v1150_v1, %v701_v0 }
 0x300   :  { %763 = vst [vmem:[%s1319_s6 + $0x88] sm:$0xff] %v702_v23 }
 0x305   :  { %v704_v24 = vpop.f32.mrf.mxu3 }
 0x306   :  { %v705_v25 = vadd.f32 %v1150_v1, %v704_v24 }
 0x308   :  { %764 = vst [vmem:[%s1319_s6 + $0x90] sm:$0xff] %v705_v25 }
 0x30d   :  { %v707_v26 = vpop.f32.mrf.mxu3 }
 0x30e   :  { %v708_v27 = vadd.f32 %v1150_v1, %v707_v26 }
 0x310   :  { %765 = vst [vmem:[%s1319_s6 + $0x98] sm:$0xff] %v708_v27 }
 0x315   :  { %v710_v28 = vpop.f32.mrf.mxu3 }
 0x316   :  { %v711_v29 = vadd.f32 %v1150_v1, %v710_v28 }
 0x318   :  { %766 = vst [vmem:[%s1319_s6 + $0xa0] sm:$0xff] %v711_v29 }
 0x31d   :  { %v713_v30 = vpop.f32.mrf.mxu3 }
 0x31e   :  { %v714_v31 = vadd.f32 %v1150_v1, %v713_v30 }
 0x320   :  { %767 = vst [vmem:[%s1319_s6 + $0xa8] sm:$0xff] %v714_v31 }
 0x325   :  { %v716_v32 = vpop.f32.mrf.mxu3 }
 0x326   :  { %v717_v33 = vadd.f32 %v1150_v1, %v716_v32 }
 0x328   :  { %768 = vst [vmem:[%s1319_s6 + $0xb0] sm:$0xff] %v717_v33 }
 0x32d   :  { %v719_v34 = vpop.f32.mrf.mxu3 }
 0x32e   :  { %v720_v35 = vadd.f32 %v1150_v1, %v719_v34 }
 0x330   :  { %769 = vst [vmem:[%s1319_s6 + $0xb8] sm:$0xff] %v720_v35 }
 0x335   :  { %v722_v36 = vpop.f32.mrf.mxu3 }
 0x336   :  { %v723_v37 = vadd.f32 %v1150_v1, %v722_v36 }
 0x338   :  { %770 = vst [vmem:[%s1319_s6 + $0xc0] sm:$0xff] %v723_v37 }
 0x33d   :  { %v725_v38 = vpop.f32.mrf.mxu3 }
 0x33e   :  { %v726_v39 = vadd.f32 %v1150_v1, %v725_v38 }
 0x340   :  { %771 = vst [vmem:[%s1319_s6 + $0xc8] sm:$0xff] %v726_v39 }
 0x345   :  { %v728_v40 = vpop.f32.mrf.mxu3 }
 0x346   :  { %v729_v41 = vadd.f32 %v1150_v1, %v728_v40 }
 0x348   :  { %772 = vst [vmem:[%s1319_s6 + $0xd0] sm:$0xff] %v729_v41 }
 0x34d   :  { %v731_v42 = vpop.f32.mrf.mxu3 }
 0x34e   :  { %v732_v43 = vadd.f32 %v1150_v1, %v731_v42 }
 0x350   :  { %773 = vst [vmem:[%s1319_s6 + $0xd8] sm:$0xff] %v732_v43 }
 0x355   :  { %v734_v44 = vpop.f32.mrf.mxu3 }
 0x356   :  { %v735_v45 = vadd.f32 %v1150_v1, %v734_v44 }
 0x358   :  { %774 = vst [vmem:[%s1319_s6 + $0xe0] sm:$0xff] %v735_v45 }
 0x35d   :  { %v737_v46 = vpop.f32.mrf.mxu3 }
 0x35e   :  { %v738_v47 = vadd.f32 %v1150_v1, %v737_v46 }
 0x360   :  { %775 = vst [vmem:[%s1319_s6 + $0xe8] sm:$0xff] %v738_v47 }
 0x365   :  { %v740_v48 = vpop.f32.mrf.mxu3 }
 0x366   :  { %v741_v49 = vadd.f32 %v1150_v1, %v740_v48 }
 0x368   :  { %776 = vst [vmem:[%s1319_s6 + $0xf0] sm:$0xff] %v741_v49 }
 0x36d   :  { %v743_v50 = vpop.f32.mrf.mxu3 }
 0x36e   :  { %v744_v51 = vadd.f32 %v1150_v1, %v743_v50 }
 0x370   :  { %777 = vst [vmem:[%s1319_s6 + $0xf8] sm:$0xff] %v744_v51 }

</bundles_post_ra>
